<compile_context>
chip_gen: v7x
topology: tpu7x:2x2x1
jax: 0.10.0
libtpu: 0.0.40
codegen_flags: <defaults>
</compile_context>

<pallas_src>
import jax
import jax.numpy as jnp
from jax.experimental import pallas as pl
from jax.experimental.pallas import tpu as pltpu

_LANES = 512                    # lane-dense tile width (4 full vregs wide)
_TILE_BYTES = 2 * 1024 * 1024   # ~2 MiB per tile -> 2(in)+2(out) bufs ~8 MiB VMEM
_SMALL_ELEMS = 8 * 128 * 64     # below this, plain XLA add beats a pallas_call
_VMEM_LIMIT = 32 * 1024 * 1024  # explicit budget, fits scoped/physical VMEM on all gens


def _add_one_kernel(x_ref, o_ref):
    # Pure VPU elementwise: load tile, add dtype-matched 1, store.
    o_ref[...] = x_ref[...] + jnp.asarray(1, dtype=o_ref.dtype)


def _add_one_tiled(x2):
    rows, cols = x2.shape
    itemsize = jnp.dtype(x2.dtype).itemsize
    # Tile rows so one tile is ~_TILE_BYTES (rounded to a multiple of 8 sublanes).
    tm_cap = max(8, (_TILE_BYTES // (cols * itemsize)) // 8 * 8)
    tm = min(rows, tm_cap)
    grid = (pl.cdiv(rows, tm),)
    return pl.pallas_call(
        _add_one_kernel,
        out_shape=jax.ShapeDtypeStruct((rows, cols), x2.dtype),
        grid=grid,
        in_specs=[pl.BlockSpec((tm, cols), lambda i: (i, 0))],
        out_specs=pl.BlockSpec((tm, cols), lambda i: (i, 0)),
        input_output_aliases={0: 0},
        compiler_params=pltpu.CompilerParams(
            dimension_semantics=("parallel",),
            vmem_limit_bytes=_VMEM_LIMIT,
        ),
    )(x2)


def gdw_forward(x):
    """JAX/Pallas equivalent of gdw.forward: returns x + 1."""
    x = jnp.asarray(x)

    # Tiny / scalar path (matches the module's `torch.tensor(1.0)` usage):
    # the pallas_call launch overhead dwarfs the work here.
    if x.size < _SMALL_ELEMS:
        return x + jnp.asarray(1, dtype=x.dtype)

    orig_shape = x.shape
    total = x.size
    cols = _LANES
    rows = -(-total // cols)          # ceil-div
    pad = rows * cols - total

    flat = x.reshape(-1)
    if pad:
        # Ragged tail: repack with padding so every store stays lane-dense.
        flat = jnp.pad(flat, (0, pad))
        out2 = _add_one_tiled(flat.reshape(rows, cols))
        return out2.reshape(-1)[:total].reshape(orig_shape)

    # Exact multiple of the lane width: no pad copy, no trailing slice copy.
    out2 = _add_one_tiled(flat.reshape(rows, cols))
    return out2.reshape(orig_shape)


if __name__ == "__main__":
    # Module usage: x = torch.tensor(1.0); output = tudui(x)
    x_scalar = jnp.asarray(1.0, dtype=jnp.float32)
    out_scalar = jax.block_until_ready(gdw_forward(x_scalar))
    assert out_scalar.shape == ()
    assert jnp.allclose(out_scalar, 2.0)

    key = jax.random.PRNGKey(0)
    k1, k2, k3 = jax.random.split(key, 3)

    # Small N-D input -> fast plain-XLA path.
    x_small = jax.random.normal(k1, (2, 4, 16, 16), dtype=jnp.float32)
    out_small = jax.block_until_ready(gdw_forward(x_small))
    assert jnp.allclose(out_small, x_small + 1.0)

    # Non-128-multiple last dim -> Pallas path with lane-dense repack + padding.
    x_mid = jax.random.normal(k2, (256, 513), dtype=jnp.float32)
    out_mid = jax.block_until_ready(gdw_forward(x_mid))
    assert jnp.allclose(out_mid, x_mid + 1.0)

    # Large, exact lane multiple -> no pad copy, multiple pipelined grid steps.
    x_big = jax.random.normal(k3, (1536, 400), dtype=jnp.float32)
    out_big = jax.block_until_ready(gdw_forward(x_big))
    assert jnp.allclose(out_big, x_big + 1.0)

    print("KERNEL_OK")
</pallas_src>

<mosaic_0001>
module attributes {stable_mosaic.version = 11 : i64} {
  func.func @_add_one_kernel(%arg0: i32, %arg1: memref<257x512xf32, #tpu.memory_space<vmem>>, %arg2: memref<257x512xf32, #tpu.memory_space<vmem>>) attributes {dimension_semantics = [#tpu.dimension_semantics<parallel>], iteration_bounds = array<i64: 1>, scalar_prefetch = 0 : i64, scratch_operands = 0 : i64, tpu.core_type = #tpu.core_type<tc>, window_params = [{transform_indices = @transform_0, window_bounds = array<i64: 257, 512>}, {transform_indices = @transform_1, window_bounds = array<i64: 257, 512>}]} {
    %c0 = arith.constant 0 : index
    %c0_0 = arith.constant 0 : index
    %0 = vector.load %arg1[%c0, %c0_0] : memref<257x512xf32, #tpu.memory_space<vmem>>, vector<257x512xf32>
    %cst = arith.constant 1.000000e+00 : f32
    %1 = vector.broadcast %cst : f32 to vector<257x512xf32>
    %2 = arith.addf %0, %1 : vector<257x512xf32>
    %c0_1 = arith.constant 0 : index
    %c0_2 = arith.constant 0 : index
    %3 = vector.load %arg2[%c0_1, %c0_2] : memref<257x512xf32, #tpu.memory_space<vmem>>, vector<257x512xf32>
    tpu.vector_store %arg2[%c0_1, %c0_2], %2 {strides = array<i32>} : memref<257x512xf32, #tpu.memory_space<vmem>>, vector<257x512xf32>,
    return
  }
  func.func @transform_0(%arg0: i32) -> (i32, i32) {
    %c0_i32 = arith.constant 0 : i32
    %c0_i32_0 = arith.constant 0 : i32
    return %arg0, %c0_i32 : i32, i32
  }
  func.func @transform_1(%arg0: i32) -> (i32, i32) {
    %c0_i32 = arith.constant 0 : i32
    %c0_i32_0 = arith.constant 0 : i32
    return %arg0, %c0_i32 : i32, i32
  }
}

</mosaic_0001>

<bundles_post_ra>
// kernel: tpu_custom_call.1
= control target key start
LH: loop header
LB: loop body
LE: loop exit
PB: predicated region body
PF: predicated region fallthrough
CT: control target
= control target key end

     0   :  { %6 = vsyncpa [#allocation3], 0  ;;  %s532_s0 = inlined_call_operand.hbm [shape: f32[257,512], index: 0, kind: input, shape index: {}, may-alias: {0,1}]   ;;  %s533_s1 = inlined_call_operand.hbm [shape: f32[257,512], index: 1, kind: output, shape index: {}, may-alias: {0,1}]  }
   0x1   :  { %7 = vsyncpa [#allocation4], 0  ;;  %s488_s6 = smov [#allocation2]   ;;  %s440_s10 = scalar_lea.hbm %s532_s0, 16896 }
   0x2   :  { %s13_s7 = sshll.u32 %s488_s6, 4  ;;  %p441_p0 = scmp.ne.s32.totalorder %s532_s0, %s440_s10  ;;  %s14_s7 = int_to_ptr.vmem [resolvable:$true] %s13_s7 }
   0x3   :  { %p444_p1 = scmp.lt.u32.totalorder %s440_s10, %s532_s0 }
   0x5   :  { %p446_p2 = pnand %p444_p1, %p441_p0 }
   0x7   :  { %449 = shalt.err (!%p446_p2)
}
   0x8   :  { %s450_s15 = scalar_lea.vmem %s14_s7, 16896  ;;  %p455_p4 = scmp.lt.s32.totalorder %s14_s7, %s14_s7 }
   0x9   :  { %p451_p3 = scmp.ne.s32.totalorder %s14_s7, %s450_s15  ;;  %p456_p5 = scmp.lt.s32.totalorder %s450_s15, %s450_s15 }
   0xb   :  { %p457_p6 = por %p456_p5, %p455_p4 }
   0xd   :  { %p458_p7 = pnand %p457_p6, %p451_p3 }
   0xf   :  { %461 = shalt.err (!%p458_p7)
}
  0x10   :  { %s489_s16 = smov 512   ;;  %s490_s17 = smov 32  }
  0x11   :  { %19 = dma.hbm_to_vmem [thread:$0]  %s532_s0, 16896, %s14_s7, [#allocation3], %s489_s16, %s489_s16, %s490_s17  }
  0x12   :  { %484 = dma.done.wait [#allocation3], 16896  }
  0x13   :  { %485 = vsyncadd [#allocation3], 4294950400  ;;  %v23_v0 = vld [vmem:[#allocation2] sm:$0xff]  ;;  %v24_v1 = vld [vmem:[#allocation2 + $0x8] sm:$0xff]  ;;  %s491_s0 = smov [#allocation5]  }
  0x14   :  { %v25_v2 = vld [vmem:[#allocation2 + $0x10] sm:$0xff]  ;;  %v155_v3 = vadd.f32 1.0, %v23_v0  ;;  %v156_v4 = vadd.f32 1.0, %v24_v1  ;;  %v26_v6 = vld [vmem:[#allocation2 + $0x18] sm:$0xff]  ;;  %v27_v7 = vld [vmem:[#allocation2 + $0x20] sm:$0xff]  ;;  %s424_s20 = sshll.u32 %s491_s0, 4  ;;  %s425_s20 = int_to_ptr.vmem [resolvable:$true] %s424_s20 }
  0x15   :  { %v157_v5 = vadd.f32 1.0, %v25_v2  ;;  %v28_v8 = vld [vmem:[#allocation2 + $0x28] sm:$0xff]  ;;  %v158_v9 = vadd.f32 1.0, %v26_v6  ;;  %v159_v10 = vadd.f32 1.0, %v27_v7  ;;  %v29_v12 = vld [vmem:[#allocation2 + $0x30] sm:$0xff]  ;;  %v30_v13 = vld [vmem:[#allocation2 + $0x38] sm:$0xff]  ;;  %p467_p9 = scmp.lt.s32.totalorder %s425_s20, %s425_s20 }
  0x16   :  { %v160_v11 = vadd.f32 1.0, %v28_v8  ;;  %v31_v14 = vld [vmem:[#allocation2 + $0x40] sm:$0xff]  ;;  %287 = vst [vmem:[#allocation5] sm:$0xff] %v155_v3  ;;  %288 = vst [vmem:[#allocation5 + $0x8] sm:$0xff] %v156_v4  ;;  %v161_v15 = vadd.f32 1.0, %v29_v12  ;;  %v162_v16 = vadd.f32 1.0, %v30_v13 }
  0x17   :  { %289 = vst [vmem:[#allocation5 + $0x10] sm:$0xff] %v157_v5  ;;  %v163_v17 = vadd.f32 1.0, %v31_v14  ;;  %v32_v18 = vld [vmem:[#allocation2 + $0x48] sm:$0xff]  ;;  %v33_v19 = vld [vmem:[#allocation2 + $0x50] sm:$0xff]  ;;  %v34_v20 = vld [vmem:[#allocation2 + $0x58] sm:$0xff]  ;;  %s462_s21 = scalar_lea.vmem %s425_s20, 16896 }
  0x18   :  { %290 = vst [vmem:[#allocation5 + $0x18] sm:$0xff] %v158_v9  ;;  %291 = vst [vmem:[#allocation5 + $0x20] sm:$0xff] %v159_v10  ;;  %v164_v21 = vadd.f32 1.0, %v32_v18  ;;  %v165_v22 = vadd.f32 1.0, %v33_v19  ;;  %v166_v23 = vadd.f32 1.0, %v34_v20  ;;  %v35_v24 = vld [vmem:[#allocation2 + $0x60] sm:$0xff]  ;;  %p463_p8 = scmp.ne.s32.totalorder %s425_s20, %s462_s21  ;;  %p468_p10 = scmp.lt.s32.totalorder %s462_s21, %s462_s21 }
  0x19   :  { %292 = vst [vmem:[#allocation5 + $0x28] sm:$0xff] %v160_v11  ;;  %v36_v25 = vld [vmem:[#allocation2 + $0x68] sm:$0xff]  ;;  %v37_v26 = vld [vmem:[#allocation2 + $0x70] sm:$0xff]  ;;  %293 = vst [vmem:[#allocation5 + $0x30] sm:$0xff] %v161_v15  ;;  %v167_v27 = vadd.f32 1.0, %v35_v24 }
  0x1a   :  { %294 = vst [vmem:[#allocation5 + $0x38] sm:$0xff] %v162_v16  ;;  %295 = vst [vmem:[#allocation5 + $0x40] sm:$0xff] %v163_v17  ;;  %v168_v28 = vadd.f32 1.0, %v36_v25  ;;  %v169_v29 = vadd.f32 1.0, %v37_v26  ;;  %v38_v30 = vld [vmem:[#allocation2 + $0x78] sm:$0xff]  ;;  %v39_v31 = vld [vmem:[#allocation2 + $0x80] sm:$0xff]  ;;  %p469_p11 = por %p468_p10, %p467_p9 }
  0x1b   :  { %v40_v32 = vld [vmem:[#allocation2 + $0x88] sm:$0xff]  ;;  %296 = vst [vmem:[#allocation5 + $0x48] sm:$0xff] %v164_v21  ;;  %297 = vst [vmem:[#allocation5 + $0x50] sm:$0xff] %v165_v22  ;;  %v170_v33 = vadd.f32 1.0, %v38_v30  ;;  %v171_v34 = vadd.f32 1.0, %v39_v31  ;;  %v41_v36 = vld [vmem:[#allocation2 + $0x90] sm:$0xff] }
  0x1c   :  { %298 = vst [vmem:[#allocation5 + $0x58] sm:$0xff] %v166_v23  ;;  %v172_v35 = vadd.f32 1.0, %v40_v32  ;;  %v42_v37 = vld [vmem:[#allocation2 + $0x98] sm:$0xff]  ;;  %v43_v38 = vld [vmem:[#allocation2 + $0xa0] sm:$0xff]  ;;  %299 = vst [vmem:[#allocation5 + $0x60] sm:$0xff] %v167_v27  ;;  %v173_v39 = vadd.f32 1.0, %v41_v36  ;;  %p470_p12 = pnand %p469_p11, %p463_p8 }
  0x1d   :  { %300 = vst [vmem:[#allocation5 + $0x68] sm:$0xff] %v168_v28  ;;  %301 = vst [vmem:[#allocation5 + $0x70] sm:$0xff] %v169_v29  ;;  %v174_v40 = vadd.f32 1.0, %v42_v37  ;;  %v175_v41 = vadd.f32 1.0, %v43_v38  ;;  %v44_v42 = vld [vmem:[#allocation2 + $0xa8] sm:$0xff]  ;;  %v45_v43 = vld [vmem:[#allocation2 + $0xb0] sm:$0xff] }
  0x1e   :  { %v46_v44 = vld [vmem:[#allocation2 + $0xb8] sm:$0xff]  ;;  %302 = vst [vmem:[#allocation5 + $0x78] sm:$0xff] %v170_v33  ;;  %303 = vst [vmem:[#allocation5 + $0x80] sm:$0xff] %v171_v34  ;;  %v176_v45 = vadd.f32 1.0, %v44_v42  ;;  %v177_v46 = vadd.f32 1.0, %v45_v43  ;;  %v47_v48 = vld [vmem:[#allocation2 + $0xc0] sm:$0xff] }
  0x1f   :  { %304 = vst [vmem:[#allocation5 + $0x88] sm:$0xff] %v172_v35  ;;  %v178_v47 = vadd.f32 1.0, %v46_v44  ;;  %v48_v49 = vld [vmem:[#allocation2 + $0xc8] sm:$0xff]  ;;  %v49_v50 = vld [vmem:[#allocation2 + $0xd0] sm:$0xff]  ;;  %305 = vst [vmem:[#allocation5 + $0x90] sm:$0xff] %v173_v39  ;;  %v179_v51 = vadd.f32 1.0, %v47_v48 }
  0x20   :  { %306 = vst [vmem:[#allocation5 + $0x98] sm:$0xff] %v174_v40  ;;  %307 = vst [vmem:[#allocation5 + $0xa0] sm:$0xff] %v175_v41  ;;  %v180_v52 = vadd.f32 1.0, %v48_v49  ;;  %v181_v53 = vadd.f32 1.0, %v49_v50  ;;  %v50_v54 = vld [vmem:[#allocation2 + $0xd8] sm:$0xff]  ;;  %v51_v55 = vld [vmem:[#allocation2 + $0xe0] sm:$0xff] }
  0x21   :  { %v52_v56 = vld [vmem:[#allocation2 + $0xe8] sm:$0xff]  ;;  %308 = vst [vmem:[#allocation5 + $0xa8] sm:$0xff] %v176_v45  ;;  %309 = vst [vmem:[#allocation5 + $0xb0] sm:$0xff] %v177_v46  ;;  %v182_v57 = vadd.f32 1.0, %v50_v54  ;;  %v183_v58 = vadd.f32 1.0, %v51_v55  ;;  %v53_v60 = vld [vmem:[#allocation2 + $0xf0] sm:$0xff] }
  0x22   :  { %310 = vst [vmem:[#allocation5 + $0xb8] sm:$0xff] %v178_v47  ;;  %v184_v59 = vadd.f32 1.0, %v52_v56  ;;  %v54_v61 = vld [vmem:[#allocation2 + $0xf8] sm:$0xff]  ;;  %v55_v62 = vld [vmem:[#allocation2 + $0x100] sm:$0xff]  ;;  %311 = vst [vmem:[#allocation5 + $0xc0] sm:$0xff] %v179_v51  ;;  %v185_v63 = vadd.f32 1.0, %v53_v60 }
  0x23   :  { %312 = vst [vmem:[#allocation5 + $0xc8] sm:$0xff] %v180_v52  ;;  %313 = vst [vmem:[#allocation5 + $0xd0] sm:$0xff] %v181_v53  ;;  %v186_v0 = vadd.f32 1.0, %v54_v61  ;;  %v187_v1 = vadd.f32 1.0, %v55_v62  ;;  %v56_v2 = vld [vmem:[#allocation2 + $0x108] sm:$0xff]  ;;  %v57_v3 = vld [vmem:[#allocation2 + $0x110] sm:$0xff] }
  0x24   :  { %v58_v4 = vld [vmem:[#allocation2 + $0x118] sm:$0xff]  ;;  %314 = vst [vmem:[#allocation5 + $0xd8] sm:$0xff] %v182_v57  ;;  %315 = vst [vmem:[#allocation5 + $0xe0] sm:$0xff] %v183_v58  ;;  %v188_v5 = vadd.f32 1.0, %v56_v2  ;;  %v189_v6 = vadd.f32 1.0, %v57_v3  ;;  %v59_v8 = vld [vmem:[#allocation2 + $0x120] sm:$0xff] }
  0x25   :  { %316 = vst [vmem:[#allocation5 + $0xe8] sm:$0xff] %v184_v59  ;;  %v190_v7 = vadd.f32 1.0, %v58_v4  ;;  %v60_v9 = vld [vmem:[#allocation2 + $0x128] sm:$0xff]  ;;  %v61_v10 = vld [vmem:[#allocation2 + $0x130] sm:$0xff]  ;;  %317 = vst [vmem:[#allocation5 + $0xf0] sm:$0xff] %v185_v63  ;;  %v191_v11 = vadd.f32 1.0, %v59_v8 }
  0x26   :  { %318 = vst [vmem:[#allocation5 + $0xf8] sm:$0xff] %v186_v0  ;;  %319 = vst [vmem:[#allocation5 + $0x100] sm:$0xff] %v187_v1  ;;  %v192_v12 = vadd.f32 1.0, %v60_v9  ;;  %v193_v13 = vadd.f32 1.0, %v61_v10  ;;  %v62_v14 = vld [vmem:[#allocation2 + $0x138] sm:$0xff]  ;;  %v63_v15 = vld [vmem:[#allocation2 + $0x140] sm:$0xff] }
  0x27   :  { %v64_v16 = vld [vmem:[#allocation2 + $0x148] sm:$0xff]  ;;  %320 = vst [vmem:[#allocation5 + $0x108] sm:$0xff] %v188_v5  ;;  %321 = vst [vmem:[#allocation5 + $0x110] sm:$0xff] %v189_v6  ;;  %v194_v17 = vadd.f32 1.0, %v62_v14  ;;  %v195_v18 = vadd.f32 1.0, %v63_v15  ;;  %v65_v20 = vld [vmem:[#allocation2 + $0x150] sm:$0xff] }
  0x28   :  { %322 = vst [vmem:[#allocation5 + $0x118] sm:$0xff] %v190_v7  ;;  %v196_v19 = vadd.f32 1.0, %v64_v16  ;;  %v66_v21 = vld [vmem:[#allocation2 + $0x158] sm:$0xff]  ;;  %v67_v22 = vld [vmem:[#allocation2 + $0x160] sm:$0xff]  ;;  %323 = vst [vmem:[#allocation5 + $0x120] sm:$0xff] %v191_v11  ;;  %v197_v23 = vadd.f32 1.0, %v65_v20 }
  0x29   :  { %324 = vst [vmem:[#allocation5 + $0x128] sm:$0xff] %v192_v12  ;;  %325 = vst [vmem:[#allocation5 + $0x130] sm:$0xff] %v193_v13  ;;  %v198_v24 = vadd.f32 1.0, %v66_v21  ;;  %v199_v25 = vadd.f32 1.0, %v67_v22  ;;  %v68_v26 = vld [vmem:[#allocation2 + $0x168] sm:$0xff]  ;;  %v69_v27 = vld [vmem:[#allocation2 + $0x170] sm:$0xff] }
  0x2a   :  { %v70_v28 = vld [vmem:[#allocation2 + $0x178] sm:$0xff]  ;;  %326 = vst [vmem:[#allocation5 + $0x138] sm:$0xff] %v194_v17  ;;  %327 = vst [vmem:[#allocation5 + $0x140] sm:$0xff] %v195_v18  ;;  %v200_v29 = vadd.f32 1.0, %v68_v26  ;;  %v201_v30 = vadd.f32 1.0, %v69_v27  ;;  %v71_v32 = vld [vmem:[#allocation2 + $0x180] sm:$0xff] }
  0x2b   :  { %328 = vst [vmem:[#allocation5 + $0x148] sm:$0xff] %v196_v19  ;;  %v202_v31 = vadd.f32 1.0, %v70_v28  ;;  %v72_v33 = vld [vmem:[#allocation2 + $0x188] sm:$0xff]  ;;  %v73_v34 = vld [vmem:[#allocation2 + $0x190] sm:$0xff]  ;;  %329 = vst [vmem:[#allocation5 + $0x150] sm:$0xff] %v197_v23  ;;  %v203_v35 = vadd.f32 1.0, %v71_v32 }
  0x2c   :  { %330 = vst [vmem:[#allocation5 + $0x158] sm:$0xff] %v198_v24  ;;  %331 = vst [vmem:[#allocation5 + $0x160] sm:$0xff] %v199_v25  ;;  %v204_v36 = vadd.f32 1.0, %v72_v33  ;;  %v205_v37 = vadd.f32 1.0, %v73_v34  ;;  %v74_v38 = vld [vmem:[#allocation2 + $0x198] sm:$0xff]  ;;  %v75_v39 = vld [vmem:[#allocation2 + $0x1a0] sm:$0xff] }
  0x2d   :  { %v76_v40 = vld [vmem:[#allocation2 + $0x1a8] sm:$0xff]  ;;  %332 = vst [vmem:[#allocation5 + $0x168] sm:$0xff] %v200_v29  ;;  %333 = vst [vmem:[#allocation5 + $0x170] sm:$0xff] %v201_v30  ;;  %v206_v41 = vadd.f32 1.0, %v74_v38  ;;  %v207_v42 = vadd.f32 1.0, %v75_v39  ;;  %v77_v44 = vld [vmem:[#allocation2 + $0x1b0] sm:$0xff] }
  0x2e   :  { %334 = vst [vmem:[#allocation5 + $0x178] sm:$0xff] %v202_v31  ;;  %v208_v43 = vadd.f32 1.0, %v76_v40  ;;  %v78_v45 = vld [vmem:[#allocation2 + $0x1b8] sm:$0xff]  ;;  %v79_v46 = vld [vmem:[#allocation2 + $0x1c0] sm:$0xff]  ;;  %335 = vst [vmem:[#allocation5 + $0x180] sm:$0xff] %v203_v35  ;;  %v209_v47 = vadd.f32 1.0, %v77_v44 }
  0x2f   :  { %336 = vst [vmem:[#allocation5 + $0x188] sm:$0xff] %v204_v36  ;;  %337 = vst [vmem:[#allocation5 + $0x190] sm:$0xff] %v205_v37  ;;  %v210_v48 = vadd.f32 1.0, %v78_v45  ;;  %v211_v49 = vadd.f32 1.0, %v79_v46  ;;  %v80_v50 = vld [vmem:[#allocation2 + $0x1c8] sm:$0xff]  ;;  %v81_v51 = vld [vmem:[#allocation2 + $0x1d0] sm:$0xff] }
  0x30   :  { %v82_v52 = vld [vmem:[#allocation2 + $0x1d8] sm:$0xff]  ;;  %338 = vst [vmem:[#allocation5 + $0x198] sm:$0xff] %v206_v41  ;;  %339 = vst [vmem:[#allocation5 + $0x1a0] sm:$0xff] %v207_v42  ;;  %v212_v53 = vadd.f32 1.0, %v80_v50  ;;  %v213_v54 = vadd.f32 1.0, %v81_v51  ;;  %v83_v56 = vld [vmem:[#allocation2 + $0x1e0] sm:$0xff] }
  0x31   :  { %340 = vst [vmem:[#allocation5 + $0x1a8] sm:$0xff] %v208_v43  ;;  %v214_v55 = vadd.f32 1.0, %v82_v52  ;;  %v84_v57 = vld [vmem:[#allocation2 + $0x1e8] sm:$0xff]  ;;  %v85_v58 = vld [vmem:[#allocation2 + $0x1f0] sm:$0xff]  ;;  %341 = vst [vmem:[#allocation5 + $0x1b0] sm:$0xff] %v209_v47  ;;  %v215_v59 = vadd.f32 1.0, %v83_v56 }
  0x32   :  { %342 = vst [vmem:[#allocation5 + $0x1b8] sm:$0xff] %v210_v48  ;;  %343 = vst [vmem:[#allocation5 + $0x1c0] sm:$0xff] %v211_v49  ;;  %v216_v60 = vadd.f32 1.0, %v84_v57  ;;  %v217_v61 = vadd.f32 1.0, %v85_v58  ;;  %v86_v62 = vld [vmem:[#allocation2 + $0x1f8] sm:$0xff]  ;;  %v87_v63 = vld [vmem:[#allocation2 + $0x200] sm:$0xff] }
  0x33   :  { %v88_v0 = vld [vmem:[#allocation2 + $0x208] sm:$0xff]  ;;  %344 = vst [vmem:[#allocation5 + $0x1c8] sm:$0xff] %v212_v53  ;;  %345 = vst [vmem:[#allocation5 + $0x1d0] sm:$0xff] %v213_v54  ;;  %v218_v1 = vadd.f32 1.0, %v86_v62  ;;  %v219_v2 = vadd.f32 1.0, %v87_v63  ;;  %v89_v4 = vld [vmem:[#allocation2 + $0x210] sm:$0xff] }
  0x34   :  { %346 = vst [vmem:[#allocation5 + $0x1d8] sm:$0xff] %v214_v55  ;;  %v220_v3 = vadd.f32 1.0, %v88_v0  ;;  %v90_v5 = vld [vmem:[#allocation2 + $0x218] sm:$0xff]  ;;  %v91_v6 = vld [vmem:[#allocation2 + $0x220] sm:$0xff]  ;;  %347 = vst [vmem:[#allocation5 + $0x1e0] sm:$0xff] %v215_v59  ;;  %v221_v7 = vadd.f32 1.0, %v89_v4 }
  0x35   :  { %348 = vst [vmem:[#allocation5 + $0x1e8] sm:$0xff] %v216_v60  ;;  %349 = vst [vmem:[#allocation5 + $0x1f0] sm:$0xff] %v217_v61  ;;  %v222_v8 = vadd.f32 1.0, %v90_v5  ;;  %v223_v9 = vadd.f32 1.0, %v91_v6  ;;  %v92_v10 = vld [vmem:[#allocation2 + $0x228] sm:$0xff]  ;;  %v93_v11 = vld [vmem:[#allocation2 + $0x230] sm:$0xff] }
  0x36   :  { %v94_v12 = vld [vmem:[#allocation2 + $0x238] sm:$0xff]  ;;  %350 = vst [vmem:[#allocation5 + $0x1f8] sm:$0xff] %v218_v1  ;;  %351 = vst [vmem:[#allocation5 + $0x200] sm:$0xff] %v219_v2  ;;  %v224_v13 = vadd.f32 1.0, %v92_v10  ;;  %v225_v14 = vadd.f32 1.0, %v93_v11  ;;  %v95_v16 = vld [vmem:[#allocation2 + $0x240] sm:$0xff] }
  0x37   :  { %352 = vst [vmem:[#allocation5 + $0x208] sm:$0xff] %v220_v3  ;;  %v226_v15 = vadd.f32 1.0, %v94_v12  ;;  %v96_v17 = vld [vmem:[#allocation2 + $0x248] sm:$0xff]  ;;  %v97_v18 = vld [vmem:[#allocation2 + $0x250] sm:$0xff]  ;;  %353 = vst [vmem:[#allocation5 + $0x210] sm:$0xff] %v221_v7  ;;  %v227_v19 = vadd.f32 1.0, %v95_v16 }
  0x38   :  { %354 = vst [vmem:[#allocation5 + $0x218] sm:$0xff] %v222_v8  ;;  %355 = vst [vmem:[#allocation5 + $0x220] sm:$0xff] %v223_v9  ;;  %v228_v20 = vadd.f32 1.0, %v96_v17  ;;  %v229_v21 = vadd.f32 1.0, %v97_v18  ;;  %v98_v22 = vld [vmem:[#allocation2 + $0x258] sm:$0xff]  ;;  %v99_v23 = vld [vmem:[#allocation2 + $0x260] sm:$0xff] }
  0x39   :  { %v100_v24 = vld [vmem:[#allocation2 + $0x268] sm:$0xff]  ;;  %356 = vst [vmem:[#allocation5 + $0x228] sm:$0xff] %v224_v13  ;;  %357 = vst [vmem:[#allocation5 + $0x230] sm:$0xff] %v225_v14  ;;  %v230_v25 = vadd.f32 1.0, %v98_v22  ;;  %v231_v26 = vadd.f32 1.0, %v99_v23  ;;  %v101_v28 = vld [vmem:[#allocation2 + $0x270] sm:$0xff] }
  0x3a   :  { %358 = vst [vmem:[#allocation5 + $0x238] sm:$0xff] %v226_v15  ;;  %v232_v27 = vadd.f32 1.0, %v100_v24  ;;  %v102_v29 = vld [vmem:[#allocation2 + $0x278] sm:$0xff]  ;;  %v103_v30 = vld [vmem:[#allocation2 + $0x280] sm:$0xff]  ;;  %359 = vst [vmem:[#allocation5 + $0x240] sm:$0xff] %v227_v19  ;;  %v233_v31 = vadd.f32 1.0, %v101_v28 }
  0x3b   :  { %360 = vst [vmem:[#allocation5 + $0x248] sm:$0xff] %v228_v20  ;;  %361 = vst [vmem:[#allocation5 + $0x250] sm:$0xff] %v229_v21  ;;  %v234_v32 = vadd.f32 1.0, %v102_v29  ;;  %v235_v33 = vadd.f32 1.0, %v103_v30  ;;  %v104_v34 = vld [vmem:[#allocation2 + $0x288] sm:$0xff]  ;;  %v105_v35 = vld [vmem:[#allocation2 + $0x290] sm:$0xff] }
  0x3c   :  { %v106_v36 = vld [vmem:[#allocation2 + $0x298] sm:$0xff]  ;;  %362 = vst [vmem:[#allocation5 + $0x258] sm:$0xff] %v230_v25  ;;  %363 = vst [vmem:[#allocation5 + $0x260] sm:$0xff] %v231_v26  ;;  %v236_v37 = vadd.f32 1.0, %v104_v34  ;;  %v237_v38 = vadd.f32 1.0, %v105_v35  ;;  %v107_v40 = vld [vmem:[#allocation2 + $0x2a0] sm:$0xff] }
  0x3d   :  { %364 = vst [vmem:[#allocation5 + $0x268] sm:$0xff] %v232_v27  ;;  %v238_v39 = vadd.f32 1.0, %v106_v36  ;;  %v108_v41 = vld [vmem:[#allocation2 + $0x2a8] sm:$0xff]  ;;  %v109_v42 = vld [vmem:[#allocation2 + $0x2b0] sm:$0xff]  ;;  %365 = vst [vmem:[#allocation5 + $0x270] sm:$0xff] %v233_v31  ;;  %v239_v43 = vadd.f32 1.0, %v107_v40 }
  0x3e   :  { %366 = vst [vmem:[#allocation5 + $0x278] sm:$0xff] %v234_v32  ;;  %367 = vst [vmem:[#allocation5 + $0x280] sm:$0xff] %v235_v33  ;;  %v240_v44 = vadd.f32 1.0, %v108_v41  ;;  %v241_v45 = vadd.f32 1.0, %v109_v42  ;;  %v110_v46 = vld [vmem:[#allocation2 + $0x2b8] sm:$0xff]  ;;  %v111_v47 = vld [vmem:[#allocation2 + $0x2c0] sm:$0xff] }
  0x3f   :  { %v112_v48 = vld [vmem:[#allocation2 + $0x2c8] sm:$0xff]  ;;  %368 = vst [vmem:[#allocation5 + $0x288] sm:$0xff] %v236_v37  ;;  %369 = vst [vmem:[#allocation5 + $0x290] sm:$0xff] %v237_v38  ;;  %v242_v49 = vadd.f32 1.0, %v110_v46  ;;  %v243_v50 = vadd.f32 1.0, %v111_v47  ;;  %v113_v52 = vld [vmem:[#allocation2 + $0x2d0] sm:$0xff] }
  0x40   :  { %370 = vst [vmem:[#allocation5 + $0x298] sm:$0xff] %v238_v39  ;;  %v244_v51 = vadd.f32 1.0, %v112_v48  ;;  %v114_v53 = vld [vmem:[#allocation2 + $0x2d8] sm:$0xff]  ;;  %v115_v54 = vld [vmem:[#allocation2 + $0x2e0] sm:$0xff]  ;;  %371 = vst [vmem:[#allocation5 + $0x2a0] sm:$0xff] %v239_v43  ;;  %v245_v55 = vadd.f32 1.0, %v113_v52 }
  0x41   :  { %372 = vst [vmem:[#allocation5 + $0x2a8] sm:$0xff] %v240_v44  ;;  %373 = vst [vmem:[#allocation5 + $0x2b0] sm:$0xff] %v241_v45  ;;  %v246_v56 = vadd.f32 1.0, %v114_v53  ;;  %v247_v57 = vadd.f32 1.0, %v115_v54  ;;  %v116_v58 = vld [vmem:[#allocation2 + $0x2e8] sm:$0xff]  ;;  %v117_v59 = vld [vmem:[#allocation2 + $0x2f0] sm:$0xff] }
  0x42   :  { %v118_v60 = vld [vmem:[#allocation2 + $0x2f8] sm:$0xff]  ;;  %374 = vst [vmem:[#allocation5 + $0x2b8] sm:$0xff] %v242_v49  ;;  %375 = vst [vmem:[#allocation5 + $0x2c0] sm:$0xff] %v243_v50  ;;  %v248_v61 = vadd.f32 1.0, %v116_v58  ;;  %v249_v62 = vadd.f32 1.0, %v117_v59  ;;  %v119_v0 = vld [vmem:[#allocation2 + $0x300] sm:$0xff] }
  0x43   :  { %376 = vst [vmem:[#allocation5 + $0x2c8] sm:$0xff] %v244_v51  ;;  %v250_v63 = vadd.f32 1.0, %v118_v60  ;;  %v120_v1 = vld [vmem:[#allocation2 + $0x308] sm:$0xff]  ;;  %v121_v2 = vld [vmem:[#allocation2 + $0x310] sm:$0xff]  ;;  %377 = vst [vmem:[#allocation5 + $0x2d0] sm:$0xff] %v245_v55  ;;  %v251_v3 = vadd.f32 1.0, %v119_v0 }
  0x44   :  { %378 = vst [vmem:[#allocation5 + $0x2d8] sm:$0xff] %v246_v56  ;;  %379 = vst [vmem:[#allocation5 + $0x2e0] sm:$0xff] %v247_v57  ;;  %v252_v4 = vadd.f32 1.0, %v120_v1  ;;  %v253_v5 = vadd.f32 1.0, %v121_v2  ;;  %v122_v6 = vld [vmem:[#allocation2 + $0x318] sm:$0xff]  ;;  %v123_v7 = vld [vmem:[#allocation2 + $0x320] sm:$0xff] }
  0x45   :  { %v124_v8 = vld [vmem:[#allocation2 + $0x328] sm:$0xff]  ;;  %380 = vst [vmem:[#allocation5 + $0x2e8] sm:$0xff] %v248_v61  ;;  %381 = vst [vmem:[#allocation5 + $0x2f0] sm:$0xff] %v249_v62  ;;  %v254_v9 = vadd.f32 1.0, %v122_v6  ;;  %v255_v10 = vadd.f32 1.0, %v123_v7  ;;  %v125_v12 = vld [vmem:[#allocation2 + $0x330] sm:$0xff] }
  0x46   :  { %382 = vst [vmem:[#allocation5 + $0x2f8] sm:$0xff] %v250_v63  ;;  %v256_v11 = vadd.f32 1.0, %v124_v8  ;;  %v126_v13 = vld [vmem:[#allocation2 + $0x338] sm:$0xff]  ;;  %v127_v14 = vld [vmem:[#allocation2 + $0x340] sm:$0xff]  ;;  %383 = vst [vmem:[#allocation5 + $0x300] sm:$0xff] %v251_v3  ;;  %v257_v15 = vadd.f32 1.0, %v125_v12 }
  0x47   :  { %384 = vst [vmem:[#allocation5 + $0x308] sm:$0xff] %v252_v4  ;;  %385 = vst [vmem:[#allocation5 + $0x310] sm:$0xff] %v253_v5  ;;  %v258_v16 = vadd.f32 1.0, %v126_v13  ;;  %v259_v17 = vadd.f32 1.0, %v127_v14  ;;  %v128_v18 = vld [vmem:[#allocation2 + $0x348] sm:$0xff]  ;;  %v129_v19 = vld [vmem:[#allocation2 + $0x350] sm:$0xff] }
  0x48   :  { %v130_v20 = vld [vmem:[#allocation2 + $0x358] sm:$0xff]  ;;  %386 = vst [vmem:[#allocation5 + $0x318] sm:$0xff] %v254_v9  ;;  %387 = vst [vmem:[#allocation5 + $0x320] sm:$0xff] %v255_v10  ;;  %v260_v21 = vadd.f32 1.0, %v128_v18  ;;  %v261_v22 = vadd.f32 1.0, %v129_v19  ;;  %v131_v24 = vld [vmem:[#allocation2 + $0x360] sm:$0xff] }
  0x49   :  { %388 = vst [vmem:[#allocation5 + $0x328] sm:$0xff] %v256_v11  ;;  %v262_v23 = vadd.f32 1.0, %v130_v20  ;;  %v132_v25 = vld [vmem:[#allocation2 + $0x368] sm:$0xff]  ;;  %v133_v26 = vld [vmem:[#allocation2 + $0x370] sm:$0xff]  ;;  %389 = vst [vmem:[#allocation5 + $0x330] sm:$0xff] %v257_v15  ;;  %v263_v27 = vadd.f32 1.0, %v131_v24 }
  0x4a   :  { %390 = vst [vmem:[#allocation5 + $0x338] sm:$0xff] %v258_v16  ;;  %391 = vst [vmem:[#allocation5 + $0x340] sm:$0xff] %v259_v17  ;;  %v264_v28 = vadd.f32 1.0, %v132_v25  ;;  %v265_v29 = vadd.f32 1.0, %v133_v26  ;;  %v134_v30 = vld [vmem:[#allocation2 + $0x378] sm:$0xff]  ;;  %v135_v31 = vld [vmem:[#allocation2 + $0x380] sm:$0xff] }
  0x4b   :  { %v136_v32 = vld [vmem:[#allocation2 + $0x388] sm:$0xff]  ;;  %392 = vst [vmem:[#allocation5 + $0x348] sm:$0xff] %v260_v21  ;;  %393 = vst [vmem:[#allocation5 + $0x350] sm:$0xff] %v261_v22  ;;  %v266_v33 = vadd.f32 1.0, %v134_v30  ;;  %v267_v34 = vadd.f32 1.0, %v135_v31  ;;  %v137_v36 = vld [vmem:[#allocation2 + $0x390] sm:$0xff] }
  0x4c   :  { %394 = vst [vmem:[#allocation5 + $0x358] sm:$0xff] %v262_v23  ;;  %v268_v35 = vadd.f32 1.0, %v136_v32  ;;  %v138_v37 = vld [vmem:[#allocation2 + $0x398] sm:$0xff]  ;;  %v139_v38 = vld [vmem:[#allocation2 + $0x3a0] sm:$0xff]  ;;  %395 = vst [vmem:[#allocation5 + $0x360] sm:$0xff] %v263_v27  ;;  %v269_v39 = vadd.f32 1.0, %v137_v36 }
  0x4d   :  { %396 = vst [vmem:[#allocation5 + $0x368] sm:$0xff] %v264_v28  ;;  %397 = vst [vmem:[#allocation5 + $0x370] sm:$0xff] %v265_v29  ;;  %v270_v40 = vadd.f32 1.0, %v138_v37  ;;  %v271_v41 = vadd.f32 1.0, %v139_v38  ;;  %v140_v42 = vld [vmem:[#allocation2 + $0x3a8] sm:$0xff]  ;;  %v141_v43 = vld [vmem:[#allocation2 + $0x3b0] sm:$0xff] }
  0x4e   :  { %v142_v44 = vld [vmem:[#allocation2 + $0x3b8] sm:$0xff]  ;;  %398 = vst [vmem:[#allocation5 + $0x378] sm:$0xff] %v266_v33  ;;  %399 = vst [vmem:[#allocation5 + $0x380] sm:$0xff] %v267_v34  ;;  %v272_v45 = vadd.f32 1.0, %v140_v42  ;;  %v273_v46 = vadd.f32 1.0, %v141_v43  ;;  %v143_v48 = vld [vmem:[#allocation2 + $0x3c0] sm:$0xff] }
  0x4f   :  { %400 = vst [vmem:[#allocation5 + $0x388] sm:$0xff] %v268_v35  ;;  %v274_v47 = vadd.f32 1.0, %v142_v44  ;;  %v144_v49 = vld [vmem:[#allocation2 + $0x3c8] sm:$0xff]  ;;  %v145_v50 = vld [vmem:[#allocation2 + $0x3d0] sm:$0xff]  ;;  %401 = vst [vmem:[#allocation5 + $0x390] sm:$0xff] %v269_v39  ;;  %v275_v51 = vadd.f32 1.0, %v143_v48 }
  0x50   :  { %402 = vst [vmem:[#allocation5 + $0x398] sm:$0xff] %v270_v40  ;;  %403 = vst [vmem:[#allocation5 + $0x3a0] sm:$0xff] %v271_v41  ;;  %v276_v52 = vadd.f32 1.0, %v144_v49  ;;  %v277_v53 = vadd.f32 1.0, %v145_v50  ;;  %v146_v54 = vld [vmem:[#allocation2 + $0x3d8] sm:$0xff]  ;;  %v147_v55 = vld [vmem:[#allocation2 + $0x3e0] sm:$0xff] }
  0x51   :  { %v148_v56 = vld [vmem:[#allocation2 + $0x3e8] sm:$0xff]  ;;  %404 = vst [vmem:[#allocation5 + $0x3a8] sm:$0xff] %v272_v45  ;;  %405 = vst [vmem:[#allocation5 + $0x3b0] sm:$0xff] %v273_v46  ;;  %v278_v57 = vadd.f32 1.0, %v146_v54  ;;  %v279_v58 = vadd.f32 1.0, %v147_v55  ;;  %v149_v60 = vld [vmem:[#allocation2 + $0x3f0] sm:$0xff] }
  0x52   :  { %406 = vst [vmem:[#allocation5 + $0x3b8] sm:$0xff] %v274_v47  ;;  %v280_v59 = vadd.f32 1.0, %v148_v56  ;;  %v150_v61 = vld [vmem:[#allocation2 + $0x3f8] sm:$0xff]  ;;  %407 = vst [vmem:[#allocation5 + $0x3c0] sm:$0xff] %v275_v51  ;;  %v281_v62 = vadd.f32 1.0, %v149_v60 }
  0x53   :  { %408 = vst [vmem:[#allocation5 + $0x3c8] sm:$0xff] %v276_v52  ;;  %409 = vst [vmem:[#allocation5 + $0x3d0] sm:$0xff] %v277_v53  ;;  %v282_v63 = vadd.f32 1.0, %v150_v61  ;;  %v151_v0 = vld [vmem:[#allocation2 + $0x400] sm:$0x1] }
  0x54   :  { %v152_v1 = vld [vmem:[#allocation2 + $0x408] sm:$0x1]  ;;  %410 = vst [vmem:[#allocation5 + $0x3d8] sm:$0xff] %v278_v57  ;;  %411 = vst [vmem:[#allocation5 + $0x3e0] sm:$0xff] %v279_v58  ;;  %v283_v2 = vadd.f32 1.0, %v151_v0 }
  0x55   :  { %412 = vst [vmem:[#allocation5 + $0x3e8] sm:$0xff] %v280_v59  ;;  %v284_v3 = vadd.f32 1.0, %v152_v1  ;;  %v153_v4 = vld [vmem:[#allocation2 + $0x410] sm:$0x1]  ;;  %v154_v5 = vld [vmem:[#allocation2 + $0x418] sm:$0x1] }
  0x56   :  { %413 = vst [vmem:[#allocation5 + $0x3f0] sm:$0xff] %v281_v62  ;;  %414 = vst [vmem:[#allocation5 + $0x3f8] sm:$0xff] %v282_v63  ;;  %v285_v6 = vadd.f32 1.0, %v153_v4  ;;  %v286_v7 = vadd.f32 1.0, %v154_v5 }
  0x57   :  { %415 = vst [vmem:[#allocation5 + $0x400] sm:$0x1] %v283_v2  ;;  %416 = vst [vmem:[#allocation5 + $0x408] sm:$0x1] %v284_v3 }
  0x58   :  { %417 = vst [vmem:[#allocation5 + $0x410] sm:$0x1] %v285_v6  ;;  %418 = vst [vmem:[#allocation5 + $0x418] sm:$0x1] %v286_v7 }
  0x59   :  { %473 = shalt.err (!%p470_p12)
}
  0x5a   :  { %s474_s24 = scalar_lea.hbm %s533_s1, 16896 }
  0x5b   :  { %p475_p13 = scmp.ne.s32.totalorder %s533_s1, %s474_s24  ;;  %p478_p0 = scmp.lt.u32.totalorder %s474_s24, %s533_s1 }
  0x5d   :  { %p480_p1 = pnand %p478_p0, %p475_p13 }
  0x5f   :  { %483 = shalt.err (!%p480_p1)
}
  0x60   :  { %430 = dma.vmem_to_hbm [thread:$0]  %s425_s20, 16896, %s533_s1, [#allocation4], %s489_s16, %s489_s16, %s490_s17  }
  0x61   :  { %486 = dma.done.wait [#allocation4], 16896  }
  0x62   :  { %487 = vsyncadd [#allocation4], 4294950400 }
  0x63   :  { %434 = vsyncpa [#allocation3], 1 }
  0x64   :  { %435 = vsyncpa [#allocation4], 1 }

</bundles_post_ra>
